<compile_context>
chip_gen: v5e
topology: v5e:2x2
jax: 0.10.0
libtpu: 0.0.40
codegen_flags: <defaults>
</compile_context>

<pallas_src>
import jax
import jax.numpy as jnp
from jax.experimental import pallas as pl
from jax.experimental.pallas import tpu as pltpu

IN_FEATURES = 32
OUT_FEATURES = 48
GROUP_N = 2
A_BIT = 8
W_BIT = 8

QMAX_A = 2.0 ** A_BIT - 1.0          # activation quant levels (255)
QMAX_W = 2.0 ** (W_BIT - 1) - 1.0    # weight quant levels (127)

LANE = 128
SUBLANE = 8
PACK = LANE // IN_FEATURES           # 4 original rows packed per lane-dense row
TM_ROWS_MAX = 4096                   # max row tile in ORIGINAL rows (review: 2048-4096)
TM_PACK_MAX = TM_ROWS_MAX // PACK    # -> 1024 packed rows; tile still tiny vs VMEM
MIN_GRID_STEPS = 4                   # keep >=4 grid steps so v7x's 2 TCs both get work


def _round_up(x, m):
    return (x + m - 1) // m * m


def _qlinear_kernel(x_ref, params_ref, w_ref, b_ref, o_ref):
    # x_ref: (TM, 128) lane-dense packed rows (4 original rows per packed row).
    x = x_ref[...]
    pos = jnp.maximum(x, 0.0)                        # shared lower clamp (half_wave='A')

    # ---- activation fake-quant: mixture over GROUP_N branches (static unroll) ----
    # clamp(x,0,r)/step rounded then rescaled ==
    #   round(min(max(x,0)*inv_step, QMAX_A)) * (step*sw)   (r >= 0)
    act = jnp.zeros_like(x)
    for g in range(GROUP_N):
        inv = params_ref[g, :][None, :]              # (1, 128) = 1/step, lane-tiled
        ssw = params_ref[GROUP_N + g, :][None, :]    # (1, 128) = step * softmax weight
        q = jnp.round(jnp.minimum(pos * inv, QMAX_A))
        act = act + q * ssw                          # zero-range group: inv=0, ssw=0 -> 0

    # ---- linear (MXU) against the block-diagonal packed weight + bias ----
    # (TM, 128) @ (128, 4*Cout) -> (TM, 4*Cout); row i holds original rows 4i..4i+3.
    o_ref[...] = (
        jnp.dot(act, w_ref[...], preferred_element_type=jnp.float32) + b_ref[...]
    )


def qlinear_forward(x, weight, bias, groups_range, alpha_activ):
    """x: (B, N, Cin) f32; weight: (Cout, Cin); bias: (Cout,)."""
    B, N, Cin = x.shape
    Cout = weight.shape[0]
    assert Cin == IN_FEATURES and Cout == OUT_FEATURES
    f32 = jnp.float32
    M = B * N

    # ---- weight fake-quant (loop-invariant, tiny -> plain jnp in the wrapper) ----
    w = weight.astype(f32)
    thresh = jnp.max(jnp.abs(w))
    sf = thresh / QMAX_W
    safe_sf = jnp.where(sf > 0.0, sf, 1.0)           # guard all-zero weight (ref would NaN)
    wq = jnp.round(jnp.clip(w, -thresh, thresh) / safe_sf) * sf          # (Cout, Cin)

    # Block-diagonal packed weight so the MXU consumes the lane-dense activations
    # directly: packed row [r0|r1|r2|r3] @ blockdiag(W.T x4) = [r0@W.T|r1@W.T|r2@W.T|r3@W.T].
    w_pack = jax.scipy.linalg.block_diag(*([wq.T] * PACK))               # (128, 4*Cout)
    b_pack = jnp.tile(bias.astype(f32), PACK)[None, :]                   # (1, 4*Cout)

    # ---- hoisted activation-quant params, lane-tiled to the packed layout ----
    sw = jax.nn.softmax(alpha_activ.astype(f32), axis=0)                 # (G, Cin)
    r = groups_range.astype(f32)[:, None]                                # (G, 1), r >= 0
    step = r / QMAX_A
    inv_step = jnp.where(step > 0.0, 1.0 / jnp.where(step > 0.0, step, 1.0), 0.0)
    inv_step = jnp.broadcast_to(inv_step, (GROUP_N, Cin))
    step_sw = jnp.broadcast_to(step, (GROUP_N, Cin)) * sw                # fold scale & mix weight
    params = jnp.concatenate(
        [jnp.tile(inv_step, (1, PACK)), jnp.tile(step_sw, (1, PACK))], axis=0
    )                                                                    # (2G, 128)

    # ---- lane-dense packing of activations: (M, 32) -> (M/4, 128) contiguous reshape ----
    x2 = x.reshape(M, Cin).astype(f32)
    M_pad = _round_up(M, PACK)
    if M_pad != M:                       # rare tiny (<=3 row) pad, only if B*N % 4 != 0
        x2 = jnp.pad(x2, ((0, M_pad - M), (0, 0)))
    M_pack = M_pad // PACK
    xp = x2.reshape(M_pack, LANE)

    # ---- row tiling: big tiles (amortize ~0.35us/step) but >= MIN_GRID_STEPS steps ----
    TM = min(TM_PACK_MAX, _round_up(pl.cdiv(M_pack, MIN_GRID_STEPS), SUBLANE))
    if TM >= M_pack:
        TM = M_pack                      # single full-extent block (full dim is allowed)
    grid_m = pl.cdiv(M_pack, TM)         # ragged last tile handled by Pallas (no host pad)

    out = pl.pallas_call(
        _qlinear_kernel,
        out_shape=jax.ShapeDtypeStruct((M_pack, PACK * Cout), f32),
        grid_spec=pltpu.PrefetchScalarGridSpec(
            num_scalar_prefetch=0,
            grid=(grid_m,),
            in_specs=[
                pl.BlockSpec((TM, LANE), lambda i: (i, 0)),
                pl.BlockSpec((2 * GROUP_N, LANE), lambda i: (0, 0)),
                pl.BlockSpec((PACK * Cin, PACK * Cout), lambda i: (0, 0)),
                pl.BlockSpec((1, PACK * Cout), lambda i: (0, 0)),
            ],
            out_specs=pl.BlockSpec((TM, PACK * Cout), lambda i: (i, 0)),
        ),
        compiler_params=pltpu.CompilerParams(dimension_semantics=("parallel",)),
    )(xp, params, w_pack, b_pack)

    # (M/4, 4*Cout) row-major == (M, Cout): free reshape, no column slice, no lane pad.
    y = out.reshape(M_pad, Cout)
    if M_pad != M:
        y = y[:M]
    return y.reshape(B, N, Cout)


def qlinear_reference(x, weight, bias, groups_range, alpha_activ):
    """Pure-JAX reference mirroring QLinear.forward (non-calibrate path) literally."""
    sw = jax.nn.softmax(alpha_activ, axis=0)
    act = jnp.zeros_like(x)
    for g in range(GROUP_N):
        r = groups_range[g]
        step = r / QMAX_A
        clamped = 0.5 * (jnp.abs(x) - jnp.abs(x - r) + r)      # == clamp(x, 0, r) for r >= 0
        q = jnp.round(clamped / jnp.where(step > 0.0, step, 1.0)) * step
        q = jnp.where(r != 0.0, q, 0.0)                        # Quant.forward: zeros if range==0
        act = act + q * sw[g]
    thresh = jnp.max(jnp.abs(weight))
    sf = thresh / QMAX_W
    wq = jnp.round(jnp.clip(weight, -thresh, thresh) / sf) * sf
    return act @ wq.T + bias


if __name__ == "__main__":
    key = jax.random.PRNGKey(0)
    k1, k2, k3 = jax.random.split(key, 3)

    B, N = 2, 8
    fan_in = IN_FEATURES
    bound = 1.0 / (fan_in ** 0.5)  # kaiming_uniform(a=sqrt(5)) -> U(-1/sqrt(fan_in), 1/sqrt(fan_in))
    weight = jax.random.uniform(k1, (OUT_FEATURES, IN_FEATURES), jnp.float32, -bound, bound)
    bias = jax.random.uniform(k2, (OUT_FEATURES,), jnp.float32, -bound, bound)
    x = jax.random.normal(k3, (B, N, IN_FEATURES), jnp.float32) * 2.0

    # Module init sets groups_range1 = zeros, which degenerately zeroes every branch;
    # use deterministic non-zero group ranges so the quantization path is exercised.
    groups_range = jnp.array([3.0, 6.0], dtype=jnp.float32)            # (GROUP_N,)
    alpha_activ = jnp.full((GROUP_N, IN_FEATURES), 0.01, jnp.float32)  # -> uniform softmax

    # TODO(synk): calibration path (_compute_threshold / two_groups / percentile scan)
    # is host-side numpy bookkeeping, not part of the inference forward; omitted.

    out = jax.jit(qlinear_forward)(x, weight, bias, groups_range, alpha_activ)
    jax.block_until_ready(out)

    ref = qlinear_reference(x, weight, bias, groups_range, alpha_activ)
    assert out.shape == (B, N, OUT_FEATURES)
    # Tolerance absorbs rare round-to-nearest tie flips between the kernel's
    # reciprocal-multiply requant and the reference's divide (worst case one quant
    # step * sw propagated through the matmul, ~2e-3); real bugs are far larger.
    assert jnp.allclose(out, ref, atol=5e-3, rtol=1e-3), "mismatch vs reference"
    print("KERNEL_OK")
</pallas_src>

<mosaic_0001>
module attributes {stable_mosaic.version = 11 : i64} {
  func.func @_qlinear_kernel(%arg0: i32, %arg1: memref<4x128xf32, #tpu.memory_space<vmem>>, %arg2: memref<4x128xf32, #tpu.memory_space<vmem>>, %arg3: memref<128x192xf32, #tpu.memory_space<vmem>>, %arg4: memref<1x192xf32, #tpu.memory_space<vmem>>, %arg5: memref<4x192xf32, #tpu.memory_space<vmem>>) attributes {dimension_semantics = [#tpu.dimension_semantics<parallel>], iteration_bounds = array<i64: 1>, scalar_prefetch = 0 : i64, scratch_operands = 0 : i64, tpu.core_type = #tpu.core_type<tc>, window_params = [{transform_indices = @transform_0, window_bounds = array<i64: 4, 128>}, {pipeline_mode = #tpu.pipeline_mode<synchronous>, transform_indices = @transform_1, window_bounds = array<i64: 4, 128>}, {pipeline_mode = #tpu.pipeline_mode<synchronous>, transform_indices = @transform_2, window_bounds = array<i64: 128, 192>}, {pipeline_mode = #tpu.pipeline_mode<synchronous>, transform_indices = @transform_3, window_bounds = array<i64: 1, 192>}, {transform_indices = @transform_4, window_bounds = array<i64: 4, 192>}]} {
    %c0 = arith.constant 0 : index
    %c0_0 = arith.constant 0 : index
    %0 = vector.load %arg1[%c0, %c0_0] : memref<4x128xf32, #tpu.memory_space<vmem>>, vector<4x128xf32>
    %cst = arith.constant 0.000000e+00 : f32
    %1 = vector.broadcast %cst : f32 to vector<4x128xf32>
    %2 = arith.maximumf %0, %1 : vector<4x128xf32>
    %cst_1 = arith.constant 0.000000e+00 : f32
    %3 = vector.broadcast %cst_1 : f32 to vector<4x128xf32>
    %c0_2 = arith.constant 0 : index
    %c0_3 = arith.constant 0 : index
    %4 = vector.load %arg2[%c0_2, %c0_3] : memref<4x128xf32, #tpu.memory_space<vmem>>, vector<1x128xf32>
    %5 = vector.shape_cast %4 : vector<1x128xf32> to vector<128xf32>
    %6 = vector.shape_cast %5 : vector<128xf32> to vector<1x128xf32>
    %c2 = arith.constant 2 : index
    %c0_4 = arith.constant 0 : index
    %7 = vector.load %arg2[%c2, %c0_4] : memref<4x128xf32, #tpu.memory_space<vmem>>, vector<1x128xf32>
    %8 = vector.shape_cast %7 : vector<1x128xf32> to vector<128xf32>
    %9 = vector.shape_cast %8 : vector<128xf32> to vector<1x128xf32>
    %10 = vector.broadcast %6 : vector<1x128xf32> to vector<4x128xf32>
    %11 = arith.mulf %2, %10 : vector<4x128xf32>
    %cst_5 = arith.constant 2.550000e+02 : f32
    %12 = vector.broadcast %cst_5 : f32 to vector<4x128xf32>
    %13 = arith.minimumf %11, %12 : vector<4x128xf32>
    %14 = math.roundeven %13 : vector<4x128xf32>
    %15 = vector.broadcast %9 : vector<1x128xf32> to vector<4x128xf32>
    %16 = arith.mulf %14, %15 : vector<4x128xf32>
    %17 = arith.addf %3, %16 : vector<4x128xf32>
    %c1 = arith.constant 1 : index
    %c0_6 = arith.constant 0 : index
    %18 = vector.load %arg2[%c1, %c0_6] : memref<4x128xf32, #tpu.memory_space<vmem>>, vector<1x128xf32>
    %19 = vector.shape_cast %18 : vector<1x128xf32> to vector<128xf32>
    %20 = vector.shape_cast %19 : vector<128xf32> to vector<1x128xf32>
    %c3 = arith.constant 3 : index
    %c0_7 = arith.constant 0 : index
    %21 = vector.load %arg2[%c3, %c0_7] : memref<4x128xf32, #tpu.memory_space<vmem>>, vector<1x128xf32>
    %22 = vector.shape_cast %21 : vector<1x128xf32> to vector<128xf32>
    %23 = vector.shape_cast %22 : vector<128xf32> to vector<1x128xf32>
    %24 = vector.broadcast %20 : vector<1x128xf32> to vector<4x128xf32>
    %25 = arith.mulf %2, %24 : vector<4x128xf32>
    %cst_8 = arith.constant 2.550000e+02 : f32
    %26 = vector.broadcast %cst_8 : f32 to vector<4x128xf32>
    %27 = arith.minimumf %25, %26 : vector<4x128xf32>
    %28 = math.roundeven %27 : vector<4x128xf32>
    %29 = vector.broadcast %23 : vector<1x128xf32> to vector<4x128xf32>
    %30 = arith.mulf %28, %29 : vector<4x128xf32>
    %31 = arith.addf %17, %30 : vector<4x128xf32>
    %c0_9 = arith.constant 0 : index
    %c0_10 = arith.constant 0 : index
    %32 = vector.load %arg3[%c0_9, %c0_10] : memref<128x192xf32, #tpu.memory_space<vmem>>, vector<128x192xf32>
    %cst_11 = arith.constant dense<0.000000e+00> : vector<4x192xf32>
    %33 = tpu.matmul %31, %32, %cst_11 {dimension_numbers = #tpu.dot_dimension_numbers<[1], [0], [0], [1], [0, 0, 1, 1], [], []>} : vector<4x128xf32>, vector<128x192xf32>, vector<4x192xf32> -> vector<4x192xf32>
    %c0_12 = arith.constant 0 : index
    %c0_13 = arith.constant 0 : index
    %34 = vector.load %arg4[%c0_12, %c0_13] : memref<1x192xf32, #tpu.memory_space<vmem>>, vector<1x192xf32>
    %35 = vector.broadcast %34 : vector<1x192xf32> to vector<4x192xf32>
    %36 = arith.addf %33, %35 : vector<4x192xf32>
    %c0_14 = arith.constant 0 : index
    %c0_15 = arith.constant 0 : index
    %37 = vector.load %arg5[%c0_14, %c0_15] : memref<4x192xf32, #tpu.memory_space<vmem>>, vector<4x192xf32>
    tpu.vector_store %arg5[%c0_14, %c0_15], %36 {strides = array<i32>} : memref<4x192xf32, #tpu.memory_space<vmem>>, vector<4x192xf32>,
    return
  }
  func.func @transform_0(%arg0: i32) -> (i32, i32) {
    %c0_i32 = arith.constant 0 : i32
    %c0_i32_0 = arith.constant 0 : i32
    return %arg0, %c0_i32 : i32, i32
  }
  func.func @transform_1(%arg0: i32) -> (i32, i32) {
    %c0_i32 = arith.constant 0 : i32
    %c0_i32_0 = arith.constant 0 : i32
    %c0_i32_1 = arith.constant 0 : i32
    return %c0_i32, %c0_i32_0 : i32, i32
  }
  func.func @transform_2(%arg0: i32) -> (i32, i32) {
    %c0_i32 = arith.constant 0 : i32
    %c0_i32_0 = arith.constant 0 : i32
    %c0_i32_1 = arith.constant 0 : i32
    return %c0_i32, %c0_i32_0 : i32, i32
  }
  func.func @transform_3(%arg0: i32) -> (i32, i32) {
    %c0_i32 = arith.constant 0 : i32
    %c0_i32_0 = arith.constant 0 : i32
    %c0_i32_1 = arith.constant 0 : i32
    return %c0_i32, %c0_i32_0 : i32, i32
  }
  func.func @transform_4(%arg0: i32) -> (i32, i32) {
    %c0_i32 = arith.constant 0 : i32
    %c0_i32_0 = arith.constant 0 : i32
    return %arg0, %c0_i32 : i32, i32
  }
}

</mosaic_0001>

<bundles_post_ra>
// kernel: tile.29
= control target key start
LH: loop header
LB: loop body
LE: loop exit
PB: predicated region body
PF: predicated region fallthrough
CT: control target
= control target key end

     0   :  { %s29_s10 = smov 3  ;;  %s45_s11 = smov 96   ;;  %vm12_vm0 = vcmask 261120   ;;  %vm19_vm1 = vcmask 1048320   ;;  %vm26_vm2 = vcmask 785920   ;;  %vm33_vm3 = vcmask 523520   ;;  %s67_s0 = inlined_call_operand.vmem [shape: f32[2,4,32], index: 0, kind: input, shape index: {}]   ;;  %s68_s1 = inlined_call_operand.vmem [shape: f32[2,128], index: 1, kind: output, shape index: {}]  }
   0x1   :  { %v41_v0 = vld [vmem:[%s67_s0 + $0x4] sm:$0xf]  ;;  %v8_v1 = vld [vmem:[%s67_s0] sm:$0xf]  ;;  %s15_s0 = smov 3  ;;  %s46_s12 = smov 32  }
   0x2   :  { %7 = vst [vmem:[#allocation1 + $0x8] sm:$0xf] %v41_v0  ;;  %s22_s13 = smov 3  ;;  %s47_s14 = smov 64  }
   0x3   :  { %9 = vst [vmem:[#allocation1] sm:$0xf] %v8_v1  ;;  %s10_s15 = smov 3 }
   0xa   :  { %v16_v2 = vld [vmem:[#allocation1 + $0x3] ss:$8 sm:%s15_s0]   ;;  %v30_v3 = vld [vmem:[#allocation1 + $0x1] ss:$8 sm:%s29_s10]   ;;  %v23_v4 = vld [vmem:[#allocation1 + $0x2] ss:$8 sm:%s22_s13]  }
   0xb   :  { %17 = vrot.lane.b32.xlu0 %v16_v2, %s45_s11  ;;  %31 = vrot.lane.b32.xlu1 %v30_v3, %s46_s12  ;;  %v11_v5 = vld [vmem:[#allocation1] ss:$8 sm:%s10_s15]  }
   0xc   :  { %13 = vst.msk [vmem:[#allocation0] sm:$0x3] %vm12_vm0, %v11_v5  }
  0x13   :  { %24 = vrot.lane.b32.xlu0 %v23_v4, %s47_s14 }
  0x7d   :  { %v18_v6 = vpop.permute.xlu0 %17   ;;  %v32_v7 = vpop.permute.xlu1 %31  }
  0x7e   :  { %20 = vst.msk [vmem:[#allocation0] sm:$0x3] %vm19_vm1, %v18_v6  }
  0x85   :  { %v25_v8 = vpop.permute.xlu0 %24  }
  0x86   :  { %27 = vst.msk [vmem:[#allocation0] sm:$0x3] %vm26_vm2, %v25_v8  }
  0x87   :  { %34 = vst.msk [vmem:[#allocation0] sm:$0x3] %vm33_vm3, %v32_v7  }
  0x8e   :  { %v37_v9 = vld [vmem:[#allocation0] sm:$0x3] }
  0x8f   :  { %40 = vst [vmem:[%s68_s1] sm:$0x3] %v37_v9 }

// kernel: tile.18
= control target key start
LH: loop header
LB: loop body
LE: loop exit
PB: predicated region body
PF: predicated region fallthrough
CT: control target
= control target key end

     0   :  { %s22_s0 = inlined_call_operand.vmem [shape: f32[48], index: 0, kind: input, shape index: {}]   ;;  %s23_s1 = inlined_call_operand.vmem [shape: f32[4,48], index: 1, kind: output, shape index: {}]  }
   0x1   :  { %v4_v0 = vld [vmem:[%s22_s0] ss:$0 sm:$0xff] }
   0x2   :  { %5 = vst [vmem:[%s23_s1] sm:$0xf] %v4_v0 }

// kernel: tile.19
= control target key start
LH: loop header
LB: loop body
LE: loop exit
PB: predicated region body
PF: predicated region fallthrough
CT: control target
= control target key end

     0   :  { %vm13_vm0 = vcmask 261120   ;;  %s52_s8 = smov 96   ;;  %s53_s9 = smov 48   ;;  %vm7_vm1 = vcmask 392192   ;;  %vm17_vm2 = vcmask 130048   ;;  %vm20_vm3 = vcmask 1048320   ;;  %s73_s0 = inlined_call_operand.vmem [shape: f32[4,48], index: 0, kind: input, shape index: {}]   ;;  %s74_s1 = inlined_call_operand.vmem [shape: f32[1,192], index: 1, kind: output, shape index: {}]  }
   0x1   :  { %v4_v0 = vld [vmem:[%s73_s0] sm:$0xf]  ;;  %s51_s0 = smov 16   ;;  %vm32_vm4 = vcmask 523392   ;;  %vm26_vm5 = vcmask 785792  }
   0x2   :  { %5 = vst [vmem:[#allocation1] sm:$0xf] %v4_v0 }
   0x9   :  { %v10_v1 = vld [vmem:[#allocation1 + $0x2] sm:$0x1]   ;;  %v29_v3 = vld [vmem:[#allocation1 + $0x3] sm:$0x1]   ;;  %v23_v5 = vld [vmem:[#allocation1 + $0x1] sm:$0x1]  }
   0xa   :  { %v12_v2 = vld [vmem:[#allocation1 + $0x2] sm:$0x1]   ;;  %30 = vrot.lane.b32.xlu1 %v29_v3, %s51_s0  ;;  %v6_v6 = vld [vmem:[#allocation1] sm:$0x1]  }
   0xb   :  { %v14_v4 = vsel %vm13_vm0, %v12_v2, %v10_v1  ;;  %8 = vst.msk [vmem:[#allocation0] sm:$0x1] %vm7_vm1, %v6_v6  }
   0xc   :  { %15 = vrot.lane.b32.xlu0 %v14_v4, %s52_s8 }
  0x14   :  { %24 = vrot.lane.b32.xlu0 %v23_v5, %s53_s9 }
  0x7c   :  { %v31_v7 = vpop.permute.xlu1 %30  }
  0x7e   :  { %v16_v8 = vpop.permute.xlu0 %15  }
  0x7f   :  { %19 = vst.msk [vmem:[#allocation0 + $0x8] sm:$0x1] %vm17_vm2, %v16_v8  }
  0x80   :  { %21 = vst.msk [vmem:[#allocation0] sm:$0x1] %vm20_vm3, %v16_v8  }
  0x81   :  { %34 = vst.msk [vmem:[#allocation0 + $0x8] sm:$0x1] %vm32_vm4, %v31_v7  }
  0x86   :  { %v25_v9 = vpop.permute.xlu0 %24  }
  0x87   :  { %27 = vst.msk [vmem:[#allocation0] sm:$0x1] %vm26_vm5, %v25_v9  }
  0x88   :  { %v42_v10 = vld [vmem:[#allocation0 + $0x8] sm:$0x1] }
  0x89   :  { %47 = vst [vmem:[%s74_s1 + $0x1] sm:$0x1] %v42_v10 }
  0x8e   :  { %v37_v11 = vld [vmem:[#allocation0] sm:$0x1] }
  0x8f   :  { %40 = vst [vmem:[%s74_s1] sm:$0x1] %v37_v11 }

// kernel: qlinear_forward.1
= control target key start
LH: loop header
LB: loop body
LE: loop exit
PB: predicated region body
PF: predicated region fallthrough
CT: control target
= control target key end

     0   :  { %vm118_vm2 = vcmask 1043456   ;;  %vm121_vm3 = vcmask 523268   ;;  %s296_s2 = inlined_call_operand.vmem [shape: f32[128,192], index: 2, kind: input, shape index: {}]   ;;  %s297_s0 = inlined_call_operand.vmem [shape: f32[4,128], index: 0, kind: input, shape index: {}]   ;;  %s298_s1 = inlined_call_operand.vmem [shape: f32[4,128], index: 1, kind: input, shape index: {}]   ;;  %s299_s3 = inlined_call_operand.vmem [shape: f32[1,192], index: 3, kind: input, shape index: {}]   ;;  %s300_s4 = inlined_call_operand.vmem [shape: f32[4,192], index: 4, kind: output, shape index: {}]  }
   0x1   :  { %v68_v0 = vld [vmem:[%s296_s2 + $0xf8] sm:$0xff]  ;;  %v67_v1 = vld [vmem:[%s296_s2 + $0xf0] sm:$0xff]  ;;  %v66_v2 = vld [vmem:[%s296_s2 + $0xe8] sm:$0xff] }
   0x2   :  { %95 = vmatpush.msra.mxu1 %v68_v0  ;;  %75 = vmatpush.msra.mxu0 %v67_v1  ;;  %v65_v3 = vld [vmem:[%s296_s2 + $0xe0] sm:$0xff]  ;;  %v64_v4 = vld [vmem:[%s296_s2 + $0xd8] sm:$0xff]  ;;  %v63_v5 = vld [vmem:[%s296_s2 + $0xd0] sm:$0xff] }
   0x3   :  { %v62_v6 = vld [vmem:[%s296_s2 + $0xc8] sm:$0xff]  ;;  %v61_v7 = vld [vmem:[%s296_s2 + $0xc0] sm:$0xff]  ;;  %v60_v8 = vld [vmem:[%s296_s2 + $0xb8] sm:$0xff] }
   0x4   :  { %96 = vmatpush.msra.mxu1 %v66_v2  ;;  %76 = vmatpush.msra.mxu0 %v65_v3  ;;  %v59_v9 = vld [vmem:[%s296_s2 + $0xb0] sm:$0xff]  ;;  %v58_v10 = vld [vmem:[%s296_s2 + $0xa8] sm:$0xff]  ;;  %v57_v11 = vld [vmem:[%s296_s2 + $0xa0] sm:$0xff] }
   0x5   :  { %v56_v12 = vld [vmem:[%s296_s2 + $0x98] sm:$0xff]  ;;  %v55_v13 = vld [vmem:[%s296_s2 + $0x90] sm:$0xff]  ;;  %v17_v14 = vld [vmem:[%s297_s0] sm:$0xf] }
   0x6   :  { %97 = vmatpush.msra.mxu1 %v64_v4  ;;  %77 = vmatpush.msra.mxu0 %v63_v5  ;;  %v54_v15 = vld [vmem:[%s296_s2 + $0x88] sm:$0xff]  ;;  %v18_v16 = vmax.f32 %v17_v14, 0.0  ;;  %v144_v17 = vld [vmem:[%s298_s1] ss:$0 sm:$0xff]  ;;  %v146_v20 = vld [vmem:[%s298_s1 + $0x1] ss:$0 sm:$0xff] }
   0x7   :  { %v53_v18 = vld [vmem:[%s296_s2 + $0x80] sm:$0xff]  ;;  %v52_v21 = vld [vmem:[%s296_s2 + $0x78] sm:$0xff]  ;;  %v51_v22 = vld [vmem:[%s296_s2 + $0x70] sm:$0xff] }
   0x8   :  { %98 = vmatpush.msra.mxu1 %v62_v6  ;;  %78 = vmatpush.msra.mxu0 %v61_v7  ;;  %v22_v19 = vmul.f32 %v144_v17, %v18_v16  ;;  %v31_v24 = vmul.f32 %v146_v20, %v18_v16  ;;  %v50_v25 = vld [vmem:[%s296_s2 + $0x68] sm:$0xff]  ;;  %v49_v26 = vld [vmem:[%s296_s2 + $0x60] sm:$0xff]  ;;  %v48_v29 = vld [vmem:[%s296_s2 + $0x58] sm:$0xff] }
   0x9   :  { %v47_v30 = vld [vmem:[%s296_s2 + $0x50] sm:$0xff]  ;;  %v46_v35 = vld [vmem:[%s296_s2 + $0x48] sm:$0xff]  ;;  %v45_v36 = vld [vmem:[%s296_s2 + $0x40] sm:$0xff] }
   0xa   :  { %99 = vmatpush.msra.mxu1 %v60_v8  ;;  %79 = vmatpush.msra.mxu0 %v59_v9  ;;  %v23_v23 = vmin.f32 %v22_v19, 255.0  ;;  %v32_v28 = vmin.f32 %v31_v24, 255.0  ;;  %v44_v41 = vld [vmem:[%s296_s2 + $0x38] sm:$0xff]  ;;  %v43_v42 = vld [vmem:[%s296_s2 + $0x30] sm:$0xff]  ;;  %v145_v44 = vld [vmem:[%s298_s1 + $0x2] ss:$0 sm:$0xff] }
   0xb   :  { %v42_v47 = vld [vmem:[%s296_s2 + $0x28] sm:$0xff]  ;;  %v41_v48 = vld [vmem:[%s296_s2 + $0x20] sm:$0xff]  ;;  %v40_v52 = vld [vmem:[%s296_s2 + $0x18] sm:$0xff] }
   0xc   :  { %100 = vmatpush.msra.mxu1 %v58_v10  ;;  %80 = vmatpush.msra.mxu0 %v57_v11  ;;  %v130_v27 = vcvt.f32.s32 %v23_v23  ;;  %v128_v31 = vand.u32 2147483647, %v23_v23  ;;  %v133_v33 = vand.u32 2147483648, %v23_v23  ;;  %v138_v34 = vcvt.f32.s32 %v32_v28  ;;  %v147_v49 = vld [vmem:[%s298_s1 + $0x3] ss:$0 sm:$0xff]  ;;  %v39_v53 = vld [vmem:[%s296_s2 + $0x10] sm:$0xff]  ;;  %vm122_vm4 = vmor %vm121_vm3, %vm118_vm2 }
   0xd   :  { %v136_v37 = vand.u32 2147483647, %v32_v28  ;;  %v141_v40 = vand.u32 2147483648, %v32_v28  ;;  %v38_v56 = vld [vmem:[%s296_s2 + $0x8] sm:$0xff]  ;;  %v37_v58 = vld [vmem:[%s296_s2] sm:$0xff] }
   0xe   :  { %101 = vmatpush.msra.mxu1 %v56_v12  ;;  %81 = vmatpush.msra.mxu0 %v55_v13  ;;  %v131_v32 = vcvt.s32.f32 %v130_v27  ;;  %v139_v39 = vcvt.s32.f32 %v138_v34  ;;  %vm260_vm0 = vcmp.lt.f32.partialorder %v128_v31, 8388608.0  ;;  %v69_v60 = vld [vmem:[%s299_s3] sm:$0x3] }
   0xf   :  { %vm137_vm1 = vcmp.lt.f32.partialorder %v136_v37, 8388608.0  ;;  %v72_v61 = vperm.slane %v69_v60, 1  ;;  %v71_v62 = vperm.slane %v69_v60, 0 }
  0x10   :  { %102 = vmatpush.msra.mxu1 %v54_v15  ;;  %82 = vmatpush.msra.mxu0 %v53_v18  ;;  %v132_v38 = vand.u32 2147483647, %v131_v32  ;;  %v140_v46 = vand.u32 2147483647, %v139_v39 }
  0x12   :  { %103 = vmatpush.msra.mxu1 %v52_v21  ;;  %83 = vmatpush.msra.mxu0 %v51_v22  ;;  %v134_v45 = vor.u32 %v133_v33, %v132_v38  ;;  %v142_v51 = vor.u32 %v141_v40, %v140_v46 }
  0x14   :  { %104 = vmatpush.msra.mxu1 %v50_v25  ;;  %84 = vmatpush.msra.mxu0 %v49_v26  ;;  %v135_v50 = vsel %vm260_vm0, %v134_v45, %v23_v23  ;;  %v143_v55 = vsel %vm137_vm1, %v142_v51, %v32_v28 }
  0x15   :  { %v26_v54 = vmul.f32 %v145_v44, %v135_v50  ;;  %v35_v57 = vmul.f32 %v147_v49, %v143_v55 }
  0x16   :  { %105 = vmatpush.msra.mxu1 %v48_v29  ;;  %85 = vmatpush.msra.mxu0 %v47_v30 }
  0x17   :  { %v36_v59 = vadd.f32 %v35_v57, %v26_v54 }
  0x18   :  { %106 = vmatpush.msra.mxu1 %v46_v35  ;;  %86 = vmatpush.msra.mxu0 %v45_v36 }
  0x1a   :  { %107 = vmatpush.msra.mxu1 %v44_v41  ;;  %87 = vmatpush.msra.mxu0 %v43_v42 }
  0x1c   :  { %108 = vmatpush.msra.mxu1 %v42_v47  ;;  %88 = vmatpush.msra.mxu0 %v41_v48 }
  0x1e   :  { %109 = vmatpush.msra.mxu1 %v40_v52  ;;  %89 = vmatpush.msra.mxu0 %v39_v53 }
  0x20   :  { %110 = vmatpush.msra.mxu1 %v38_v56  ;;  %90 = vmatpush.msra.mxu0 %v37_v58 }
  0x21   :  { %111 = vmatmul.f32.vlgmr.msra.gmra.mxu1 %v36_v59  ;;  %91 = vmatmul.f32.vlgmr.msra.gmra.mxu0 %v36_v59 }
  0x9e   :  { %v112_v63 = vpop.f32.mrf.mxu1  ;;  %v92_v0 = vpop.f32.mrf.mxu0 }
  0x9f   :  { %v113_v1 = vadd.f32 %v112_v63, %v72_v61  ;;  %v93_v2 = vadd.f32 %v92_v0, %v71_v62 }
  0xa1   :  { %v117_v3 = vrot.slane %v113_v1, 4 }
  0xa3   :  { %v119_v4 = vsel %vm118_vm2, %v93_v2, %v117_v3 }
  0xa4   :  { %123 = vst.msk [vmem:[%s300_s4] sm:$0xff] %vm122_vm4, %v119_v4 }

</bundles_post_ra>
